<compile_context>
chip_gen: v7x
topology: tpu7x:2x2x1
jax: 0.10.0
libtpu: 0.0.40
codegen_flags: <defaults>
</compile_context>

<pallas_src>
import functools
import math

import jax
import jax.numpy as jnp
from jax.experimental import pallas as pl
from jax.experimental.pallas import tpu as pltpu

_LANE = 128        # lane width: pad every feature dim to a multiple of this
_SUBLANE = 8       # sublane width: pad batch to a multiple of this
_VMEM_BUDGET = 44 << 20      # TB-shrink threshold: keep all-resident design v7x-safe
_VMEM_LIMIT_CAP = 56 << 20   # never request more scoped VMEM (v7x physical = 64 MiB/TC)


def _round_up(x, m):
    return (x + m - 1) // m * m


def _estimate_vmem_bytes(TB, in_pad, out_pad, weights, out_dtype):
    """Rough scoped-VMEM requirement of the fused kernel at batch tile TB."""
    out_itemsize = jnp.dtype(out_dtype).itemsize
    x_tile = 2 * TB * in_pad * 4                        # double-buffered f32 input tile
    o_tile = 2 * TB * out_pad * out_itemsize            # double-buffered output tile
    w_res = sum(int(w.size) * w.dtype.itemsize for w in weights)   # Buffered(1) weights
    b_res = sum(8 * int(w.shape[1]) * 4 for w in weights)          # (1,N) pads to 8 sublanes
    max_pad = max([in_pad] + [int(w.shape[1]) for w in weights])
    act_tmp = 3 * TB * max_pad * 4                      # f32 activation temporaries
    return x_tile + o_tile + w_res + b_res + act_tmp


# ----------------------------------------------------------------------------
# Fused MLP kernel: all layers in one pass, activations stay in VMEM/vregs
# ----------------------------------------------------------------------------
def _fused_mlp_kernel(*refs, acts, true_out_dims):
    """refs = (x_ref, w0_ref, b0_ref, w1_ref, b1_ref, ..., o_ref)."""
    n_layers = len(acts)
    x_ref = refs[0]
    o_ref = refs[-1]
    wb_refs = refs[1:-1]

    h = x_ref[...].astype(jnp.float32)              # (TB, in_pad)
    for i in range(n_layers):                       # unrolled: few layers
        w = wb_refs[2 * i][...]                     # (in_pad_i, out_pad_i), pre-transposed
        b = wb_refs[2 * i + 1][...]                 # (1, out_pad_i), f32
        # MXU-native (TB,K)@(K,N); cast h to the stored weight dtype (bf16 by
        # default -> full-rate MXU on v6e/v7x), accumulate in f32.
        y = jnp.dot(h.astype(w.dtype), w,
                    preferred_element_type=jnp.float32) + b

        act = acts[i]
        if act == "sigmoid":
            # tanh formulation: single EUP op, no VPU divide, f32 math (v5e-safe).
            y = 0.5 * jnp.tanh(0.5 * y) + 0.5
        elif act == "softmax":                      # nn.Softmax(dim=1)
            true_n = true_out_dims[i]
            if true_n != y.shape[-1]:
                # mask padded lanes so they don't pollute max / denominator
                lane = jax.lax.broadcasted_iota(jnp.int32, y.shape, 1)
                y = jnp.where(lane < true_n, y, -jnp.inf)
            y = y - jnp.max(y, axis=-1, keepdims=True)
            e = jnp.exp(y)
            # exact normalization (runs once per call; not throughput-critical)
            y = e / jnp.sum(e, axis=-1, keepdims=True)
        # act is None -> identity
        h = y

    o_ref[...] = h.astype(o_ref.dtype)


def fused_mlp_forward(x_padded, weights, biases, acts, true_out_dims, batch_tile,
                      out_dtype=jnp.float32):
    """One pallas_call for the whole network.

    x_padded : (pB, in_pad)  f32, batch and features already padded
    weights  : list of (in_pad_i, out_pad_i) pre-transposed, zero-padded
    biases   : list of (1, out_pad_i) f32, zero-padded
    """
    pB, in_pad = x_padded.shape
    out_pad = int(weights[-1].shape[1])
    TB = batch_tile
    assert pB % TB == 0

    kernel = functools.partial(
        _fused_mlp_kernel, acts=tuple(acts), true_out_dims=tuple(true_out_dims)
    )

    in_specs = [pl.BlockSpec((TB, in_pad), lambda i: (i, 0))]
    operands = [x_padded]
    for w, b in zip(weights, biases):
        # constant index_map -> DMA'd once, resident across tiles;
        # Buffered(1): no pointless double-buffering of never-changing blocks.
        in_specs.append(pl.BlockSpec(w.shape, lambda i: (0, 0),
                                     pipeline_mode=pl.Buffered(1)))
        in_specs.append(pl.BlockSpec(b.shape, lambda i: (0, 0),
                                     pipeline_mode=pl.Buffered(1)))
        operands.append(w)
        operands.append(b)

    # Explicit scoped-VMEM limit: resident weights + tiles + temporaries + headroom.
    est = _estimate_vmem_bytes(TB, in_pad, out_pad, weights, out_dtype)
    vmem_limit = int(min(max(est * 1.25 + (2 << 20), 32 << 20), _VMEM_LIMIT_CAP))

    out_itemsize = jnp.dtype(out_dtype).itemsize
    flops = 2 * pB * sum(int(w.shape[0]) * int(w.shape[1]) for w in weights)
    transcendentals = pB * sum(int(w.shape[1])
                               for w, a in zip(weights, acts) if a is not None)
    bytes_accessed = (pB * in_pad * 4 + pB * out_pad * out_itemsize
                      + sum(int(w.size) * w.dtype.itemsize for w in weights)
                      + sum(int(b.size) * b.dtype.itemsize for b in biases))

    return pl.pallas_call(
        kernel,
        out_shape=jax.ShapeDtypeStruct((pB, out_pad), out_dtype),
        grid=(pB // TB,),
        in_specs=in_specs,
        out_specs=pl.BlockSpec((TB, out_pad), lambda i: (i, 0)),
        compiler_params=pltpu.CompilerParams(
            dimension_semantics=("parallel",),     # shard batch tiles across TCs (v7x)
            vmem_limit_bytes=vmem_limit),
        cost_estimate=pl.CostEstimate(flops=int(flops),
                                      transcendentals=int(transcendentals),
                                      bytes_accessed=int(bytes_accessed)),
    )(*operands)


# ----------------------------------------------------------------------------
# Module wrapper mirroring FeedForwardSoftmax
# ----------------------------------------------------------------------------
class FeedForwardSoftmaxPallas:
    def __init__(self, inputN, outputN, hiddenNs=None, bias=True, key=None,
                 compute_dtype=jnp.bfloat16, out_dtype=jnp.float32, batch_tile=512):
        """compute_dtype: weight storage/matmul input dtype (bf16 default: full-rate
        MXU on v6e/v7x, half the weight VMEM/DMA everywhere; f32 accumulate and f32
        activation math are kept so v5e is safe). out_dtype: kernel output dtype
        (bf16 halves lane-padded write-back traffic). batch_tile: rows per grid
        step (512 default; auto-adjusted per call for megacore + VMEM budget)."""
        if hiddenNs is None:
            hiddenNs = []
        layer_sizes = [inputN] + list(hiddenNs) + [outputN]
        self._layer_sizes = layer_sizes
        self._padded_sizes = [_round_up(s, _LANE) for s in layer_sizes]
        # same (quirky) method list construction as the PyTorch module defaults
        self._methods = ["sigmoid"] + ["sigmoid"] * len(hiddenNs) + ["softmax"]
        self._batch_tile = int(batch_tile)
        self._out_dtype = out_dtype

        if key is None:
            key = jax.random.PRNGKey(0)

        self.weights = []       # padded, pre-transposed (in_pad, out_pad), compute_dtype
        self.biases = []        # padded (1, out_pad), f32
        self._weights_ref = []  # unpadded PyTorch layout (out, in), f32 (reference only)
        self._biases_ref = []
        for i in range(len(layer_sizes) - 1):
            fan_in, fan_out = layer_sizes[i], layer_sizes[i + 1]
            key, kw, kb = jax.random.split(key, 3)
            bound = 1.0 / math.sqrt(fan_in)        # torch nn.Linear default init
            w = jax.random.uniform(kw, (fan_out, fan_in), jnp.float32, -bound, bound)
            if bias:
                bvec = jax.random.uniform(kb, (1, fan_out), jnp.float32, -bound, bound)
            else:
                bvec = jnp.zeros((1, fan_out), jnp.float32)

            in_pad, out_pad = self._padded_sizes[i], self._padded_sizes[i + 1]
            wp = jnp.zeros((in_pad, out_pad), jnp.float32).at[:fan_in, :fan_out].set(w.T)
            bp = jnp.zeros((1, out_pad), jnp.float32).at[:, :fan_out].set(bvec)

            self.weights.append(wp.astype(compute_dtype))
            self.biases.append(bp)
            self._weights_ref.append(w)
            self._biases_ref.append(bvec)

    def _activation_list(self, outMethod):
        n_layers = len(self.weights)
        acts = []
        for i in range(n_layers):
            if i != n_layers - 1:
                acts.append(self._methods[i])
            elif outMethod:
                acts.append(self._methods[i])  # exact (quirky) indexing of the original
            else:
                acts.append(None)
        return tuple(acts)

    def forward(self, x, outMethod=True):
        x = jnp.asarray(x, dtype=jnp.float32)
        B, inN = x.shape
        in_pad = self._padded_sizes[0]
        out_pad = self._padded_sizes[-1]
        outN = self._layer_sizes[-1]

        # --- batch tiling: big tiles, but >=2 grid steps (v7x megacore) and
        # --- small enough that the all-resident-weight design fits VMEM.
        pB0 = _round_up(max(B, 1), _SUBLANE)
        TB = _round_up(min(self._batch_tile, pB0), _SUBLANE)
        if pB0 >= 2 * _SUBLANE and TB > pB0 // 2:
            TB = _round_up(pB0 // 2, _SUBLANE)
        while TB > _SUBLANE and _estimate_vmem_bytes(
                TB, in_pad, out_pad, self.weights, self._out_dtype) > _VMEM_BUDGET:
            TB = max(_SUBLANE, _round_up(TB // 2, _SUBLANE))
        # TODO(synk): if even TB=8 exceeds the budget (very wide hidden layers),
        # stream the widest layer's weight over a K/N grid axis instead of keeping
        # every weight resident.
        pB = _round_up(pB0, TB)

        # --- skip the pad copy (an extra HBM read+write) when already aligned
        if B == pB and inN == in_pad:
            xp = x
        else:
            xp = jnp.zeros((pB, in_pad), jnp.float32).at[:B, :inN].set(x)

        out_p = fused_mlp_forward(
            xp, self.weights, self.biases,
            self._activation_list(outMethod),
            tuple(self._layer_sizes[1:]), TB, out_dtype=self._out_dtype)

        # --- skip the output slice (another HBM pass) when already aligned
        if B == pB and outN == out_pad:
            return out_p
        return out_p[:B, :outN]


# ----------------------------------------------------------------------------
# Pure-JAX reference for self-checks (f32, unpadded)
# ----------------------------------------------------------------------------
def _reference_forward(model, x, outMethod=True):
    x = jnp.asarray(x, jnp.float32)
    n_layers = len(model._weights_ref)
    acts = model._activation_list(outMethod)
    for i in range(n_layers):
        x = x @ model._weights_ref[i].T + model._biases_ref[i]
        if acts[i] == "sigmoid":
            x = jax.nn.sigmoid(x)
        elif acts[i] == "softmax":
            x = jax.nn.softmax(x, axis=1)
    return x


if __name__ == "__main__":
    key = jax.random.PRNGKey(0)
    k_in, k_in2, k_model = jax.random.split(key, 3)

    batch, inputN, hiddenNs, outputN = 2, 16, [32], 8
    x = jax.random.normal(k_in, (batch, inputN), dtype=jnp.float32)

    # 1) default config: bf16 weights, f32 accumulate/activations/output
    model = FeedForwardSoftmaxPallas(inputN, outputN, hiddenNs=hiddenNs,
                                     bias=True, key=k_model)
    out = jax.block_until_ready(model.forward(x, outMethod=True))
    ref = _reference_forward(model, x, outMethod=True)
    assert out.shape == (batch, outputN)
    assert jnp.all(jnp.isfinite(out))
    assert jnp.allclose(out, ref, atol=3e-2, rtol=3e-2)   # bf16 weight quantization

    # 2) exact f32 config, both outMethod paths (tight tolerance)
    model_f32 = FeedForwardSoftmaxPallas(inputN, outputN, hiddenNs=hiddenNs, bias=True,
                                         key=k_model, compute_dtype=jnp.float32)
    out_t = jax.block_until_ready(model_f32.forward(x, outMethod=True))
    out_f = jax.block_until_ready(model_f32.forward(x, outMethod=False))
    assert jnp.allclose(out_t, _reference_forward(model_f32, x, True), atol=2e-5, rtol=2e-5)
    assert jnp.allclose(out_f, _reference_forward(model_f32, x, False), atol=2e-5, rtol=2e-5)

    # 3) multi-tile / megacore path: batch large enough for >= 2 grid steps
    xb = jax.random.normal(k_in2, (64, inputN), dtype=jnp.float32)
    out_b = jax.block_until_ready(model_f32.forward(xb, outMethod=True))
    ref_b = _reference_forward(model_f32, xb, outMethod=True)
    assert out_b.shape == (64, outputN)
    assert jnp.allclose(out_b, ref_b, atol=2e-5, rtol=2e-5)

    # 4) in-kernel masked softmax path (exact normalization), f32 weights
    pB = _round_up(batch, _SUBLANE)
    xp = jnp.zeros((pB, model_f32._padded_sizes[0]), jnp.float32).at[:batch, :inputN].set(x)
    out_s = fused_mlp_forward(xp, model_f32.weights, model_f32.biases,
                              ("sigmoid", "softmax"),
                              tuple(model_f32._layer_sizes[1:]), pB)
    out_s = jax.block_until_ready(out_s)[:batch, :outputN]
    h = jax.nn.sigmoid(x @ model_f32._weights_ref[0].T + model_f32._biases_ref[0])
    ref_s = jax.nn.softmax(h @ model_f32._weights_ref[1].T + model_f32._biases_ref[1], axis=1)
    assert jnp.all(jnp.isfinite(out_s))
    assert jnp.allclose(jnp.sum(out_s, axis=1), 1.0, atol=1e-4)
    assert jnp.allclose(out_s, ref_s, atol=1e-4, rtol=1e-4)

    # 5) bf16 output-dtype option (halves lane-padded write-back traffic)
    model_b16o = FeedForwardSoftmaxPallas(inputN, outputN, hiddenNs=hiddenNs, bias=True,
                                          key=k_model, out_dtype=jnp.bfloat16)
    out_b16 = jax.block_until_ready(model_b16o.forward(x, outMethod=True))
    assert out_b16.dtype == jnp.bfloat16
    assert jnp.allclose(out_b16.astype(jnp.float32), ref, atol=3e-2, rtol=3e-2)

    print("KERNEL_OK")
</pallas_src>

<mosaic_0001>
module attributes {stable_mosaic.version = 11 : i64} {
  func.func @_fused_mlp_kernel(%arg0: i32, %arg1: memref<8x128xf32, #tpu.memory_space<vmem>>, %arg2: memref<128x128xbf16, #tpu.memory_space<vmem>>, %arg3: memref<1x128xf32, #tpu.memory_space<vmem>>, %arg4: memref<128x128xbf16, #tpu.memory_space<vmem>>, %arg5: memref<1x128xf32, #tpu.memory_space<vmem>>, %arg6: memref<8x128xf32, #tpu.memory_space<vmem>>) attributes {dimension_semantics = [#tpu.dimension_semantics<parallel>], iteration_bounds = array<i64: 1>, scalar_prefetch = 0 : i64, scratch_operands = 0 : i64, tpu.core_type = #tpu.core_type<tc>, window_params = [{transform_indices = @transform_0, window_bounds = array<i64: 8, 128>}, {pipeline_mode = #tpu.pipeline_mode<synchronous>, transform_indices = @transform_1, window_bounds = array<i64: 128, 128>}, {pipeline_mode = #tpu.pipeline_mode<synchronous>, transform_indices = @transform_2, window_bounds = array<i64: 1, 128>}, {pipeline_mode = #tpu.pipeline_mode<synchronous>, transform_indices = @transform_3, window_bounds = array<i64: 128, 128>}, {pipeline_mode = #tpu.pipeline_mode<synchronous>, transform_indices = @transform_4, window_bounds = array<i64: 1, 128>}, {transform_indices = @transform_5, window_bounds = array<i64: 8, 128>}]} {
    %c0 = arith.constant 0 : index
    %c0_0 = arith.constant 0 : index
    %0 = vector.load %arg1[%c0, %c0_0] : memref<8x128xf32, #tpu.memory_space<vmem>>, vector<8x128xf32>
    %c0_1 = arith.constant 0 : index
    %c0_2 = arith.constant 0 : index
    %1 = vector.load %arg2[%c0_1, %c0_2] : memref<128x128xbf16, #tpu.memory_space<vmem>>, vector<128x128xbf16>
    %c0_3 = arith.constant 0 : index
    %c0_4 = arith.constant 0 : index
    %2 = vector.load %arg3[%c0_3, %c0_4] : memref<1x128xf32, #tpu.memory_space<vmem>>, vector<1x128xf32>
    %3 = arith.truncf %0 : vector<8x128xf32> to vector<8x128xbf16>
    %cst = arith.constant dense<0.000000e+00> : vector<8x128xf32>
    %4 = tpu.matmul %3, %1, %cst {dimension_numbers = #tpu.dot_dimension_numbers<[1], [0], [0], [1], [0, 0, 1, 1], [], []>} : vector<8x128xbf16>, vector<128x128xbf16>, vector<8x128xf32> -> vector<8x128xf32>
    %5 = vector.broadcast %2 : vector<1x128xf32> to vector<8x128xf32>
    %6 = arith.addf %4, %5 : vector<8x128xf32>
    %cst_5 = arith.constant 5.000000e-01 : f32
    %7 = vector.broadcast %cst_5 : f32 to vector<8x128xf32>
    %8 = arith.mulf %7, %6 : vector<8x128xf32>
    %9 = math.tanh %8 : vector<8x128xf32>
    %cst_6 = arith.constant 5.000000e-01 : f32
    %10 = vector.broadcast %cst_6 : f32 to vector<8x128xf32>
    %11 = arith.mulf %10, %9 : vector<8x128xf32>
    %cst_7 = arith.constant 5.000000e-01 : f32
    %12 = vector.broadcast %cst_7 : f32 to vector<8x128xf32>
    %13 = arith.addf %11, %12 : vector<8x128xf32>
    %c0_8 = arith.constant 0 : index
    %c0_9 = arith.constant 0 : index
    %14 = vector.load %arg4[%c0_8, %c0_9] : memref<128x128xbf16, #tpu.memory_space<vmem>>, vector<128x128xbf16>
    %c0_10 = arith.constant 0 : index
    %c0_11 = arith.constant 0 : index
    %15 = vector.load %arg5[%c0_10, %c0_11] : memref<1x128xf32, #tpu.memory_space<vmem>>, vector<1x128xf32>
    %16 = arith.truncf %13 : vector<8x128xf32> to vector<8x128xbf16>
    %cst_12 = arith.constant dense<0.000000e+00> : vector<8x128xf32>
    %17 = tpu.matmul %16, %14, %cst_12 {dimension_numbers = #tpu.dot_dimension_numbers<[1], [0], [0], [1], [0, 0, 1, 1], [], []>} : vector<8x128xbf16>, vector<128x128xbf16>, vector<8x128xf32> -> vector<8x128xf32>
    %18 = vector.broadcast %15 : vector<1x128xf32> to vector<8x128xf32>
    %19 = arith.addf %17, %18 : vector<8x128xf32>
    %cst_13 = arith.constant 5.000000e-01 : f32
    %20 = vector.broadcast %cst_13 : f32 to vector<8x128xf32>
    %21 = arith.mulf %20, %19 : vector<8x128xf32>
    %22 = math.tanh %21 : vector<8x128xf32>
    %cst_14 = arith.constant 5.000000e-01 : f32
    %23 = vector.broadcast %cst_14 : f32 to vector<8x128xf32>
    %24 = arith.mulf %23, %22 : vector<8x128xf32>
    %cst_15 = arith.constant 5.000000e-01 : f32
    %25 = vector.broadcast %cst_15 : f32 to vector<8x128xf32>
    %26 = arith.addf %24, %25 : vector<8x128xf32>
    %c0_16 = arith.constant 0 : index
    %c0_17 = arith.constant 0 : index
    %27 = vector.load %arg6[%c0_16, %c0_17] : memref<8x128xf32, #tpu.memory_space<vmem>>, vector<8x128xf32>
    tpu.vector_store %arg6[%c0_16, %c0_17], %26 {strides = array<i32>} : memref<8x128xf32, #tpu.memory_space<vmem>>, vector<8x128xf32>,
    return
  }
  func.func @transform_0(%arg0: i32) -> (i32, i32) {
    %c0_i32 = arith.constant 0 : i32
    %c0_i32_0 = arith.constant 0 : i32
    return %arg0, %c0_i32 : i32, i32
  }
  func.func @transform_1(%arg0: i32) -> (i32, i32) {
    %c0_i32 = arith.constant 0 : i32
    %c0_i32_0 = arith.constant 0 : i32
    %c0_i32_1 = arith.constant 0 : i32
    return %c0_i32, %c0_i32_0 : i32, i32
  }
  func.func @transform_2(%arg0: i32) -> (i32, i32) {
    %c0_i32 = arith.constant 0 : i32
    %c0_i32_0 = arith.constant 0 : i32
    %c0_i32_1 = arith.constant 0 : i32
    return %c0_i32, %c0_i32_0 : i32, i32
  }
  func.func @transform_3(%arg0: i32) -> (i32, i32) {
    %c0_i32 = arith.constant 0 : i32
    %c0_i32_0 = arith.constant 0 : i32
    %c0_i32_1 = arith.constant 0 : i32
    return %c0_i32, %c0_i32_0 : i32, i32
  }
  func.func @transform_4(%arg0: i32) -> (i32, i32) {
    %c0_i32 = arith.constant 0 : i32
    %c0_i32_0 = arith.constant 0 : i32
    %c0_i32_1 = arith.constant 0 : i32
    return %c0_i32, %c0_i32_0 : i32, i32
  }
  func.func @transform_5(%arg0: i32) -> (i32, i32) {
    %c0_i32 = arith.constant 0 : i32
    %c0_i32_0 = arith.constant 0 : i32
    return %arg0, %c0_i32 : i32, i32
  }
}

</mosaic_0001>

<bundles_post_ra>
// kernel: tpu_custom_call.1
= control target key start
LH: loop header
LB: loop body
LE: loop exit
PB: predicated region body
PF: predicated region fallthrough
CT: control target
= control target key end

     0   :  { %10 = vsyncpa [#allocation3], 0  ;;  %s607_s0 = inlined_call_operand.hbm [shape: f32[8,128], index: 0, kind: input, shape index: {}]   ;;  %s608_s1 = inlined_call_operand.hbm [shape: bf16[128,128], index: 1, kind: input, shape index: {}]   ;;  %s609_s2 = inlined_call_operand.vmem [shape: f32[1,128], index: 2, kind: input, shape index: {}]   ;;  %s610_s3 = inlined_call_operand.hbm [shape: bf16[128,128], index: 3, kind: input, shape index: {}]   ;;  %s611_s4 = inlined_call_operand.vmem [shape: f32[1,128], index: 4, kind: input, shape index: {}]   ;;  %s612_s5 = inlined_call_operand.hbm [shape: f32[8,128], index: 5, kind: output, shape index: {}]  }
   0x1   :  { %11 = vsyncpa [#allocation6], 0 }
   0x2   :  { %12 = vsyncpa [#allocation4], 0  ;;  %s509_s18 = smov [#allocation5]   ;;  %s415_s22 = scalar_lea.hbm %s608_s1, 1024 }
   0x3   :  { %s28_s19 = sshll.u32 %s509_s18, 4  ;;  %p416_p0 = scmp.ne.s32.totalorder %s608_s1, %s415_s22  ;;  %s29_s19 = int_to_ptr.vmem [resolvable:$true] %s28_s19 }
   0x4   :  { %p419_p1 = scmp.lt.u32.totalorder %s415_s22, %s608_s1 }
   0x6   :  { %p421_p2 = pnand %p419_p1, %p416_p0 }
   0x8   :  { %424 = shalt.err (!%p421_p2)
}
   0x9   :  { %s425_s27 = scalar_lea.vmem %s29_s19, 1024  ;;  %p430_p4 = scmp.lt.s32.totalorder %s29_s19, %s29_s19 }
   0xa   :  { %p426_p3 = scmp.ne.s32.totalorder %s29_s19, %s425_s27  ;;  %p431_p5 = scmp.lt.s32.totalorder %s425_s27, %s425_s27 }
   0xc   :  { %p432_p6 = por %p431_p5, %p430_p4 }
   0xe   :  { %p433_p7 = pnand %p432_p6, %p426_p3 }
  0x10   :  { %436 = shalt.err (!%p433_p7)
}
  0x11   :  { %s510_s28 = smov 64   ;;  %s511_s29 = smov 4  }
  0x12   :  { %34 = dma.hbm_to_vmem [thread:$0]  %s608_s1, 1024, %s29_s19, [#allocation6], %s510_s28, %s510_s28, %s511_s29  }
  0x13   :  { %s512_s7 = smov [#allocation2]   ;;  %s513_s9 = smov [#allocation7]  }
  0x14   :  { %s19_s8 = sshll.u32 %s512_s7, 4  ;;  %s42_s10 = sshll.u32 %s513_s9, 4  ;;  %s20_s8 = int_to_ptr.vmem [resolvable:$true] %s19_s8  ;;  %s43_s10 = int_to_ptr.vmem [resolvable:$true] %s42_s10 }
  0x15   :  { %s437_s13 = scalar_lea.hbm %s607_s0, 128 }
  0x16   :  { %p438_p8 = scmp.ne.s32.totalorder %s607_s0, %s437_s13  ;;  %p441_p9 = scmp.lt.u32.totalorder %s437_s13, %s607_s0 }
  0x18   :  { %p443_p10 = pnand %p441_p9, %p438_p8 }
  0x1a   :  { %446 = shalt.err (!%p443_p10)
}
  0x1b   :  { %s447_s1 = scalar_lea.vmem %s20_s8, 128  ;;  %p452_p12 = scmp.lt.s32.totalorder %s20_s8, %s20_s8 }
  0x1c   :  { %p448_p11 = scmp.ne.s32.totalorder %s20_s8, %s447_s1  ;;  %p453_p13 = scmp.lt.s32.totalorder %s447_s1, %s447_s1 }
  0x1e   :  { %p454_p0 = por %p453_p13, %p452_p12 }
  0x20   :  { %p455_p1 = pnand %p454_p0, %p448_p11 }
  0x22   :  { %458 = shalt.err (!%p455_p1)
}
  0x23   :  { %22 = dma.hbm_to_vmem [thread:$0]  %s607_s0, 128, %s20_s8, [#allocation3]  }
  0x24   :  { %s459_s22 = scalar_lea.hbm %s610_s3, 1024 }
  0x25   :  { %p460_p2 = scmp.ne.s32.totalorder %s610_s3, %s459_s22  ;;  %p463_p3 = scmp.lt.u32.totalorder %s459_s22, %s610_s3 }
  0x27   :  { %p465_p4 = pnand %p463_p3, %p460_p2 }
  0x29   :  { %468 = shalt.err (!%p465_p4)
}
  0x2a   :  { %s469_s27 = scalar_lea.vmem %s43_s10, 1024  ;;  %p474_p6 = scmp.lt.s32.totalorder %s43_s10, %s43_s10 }
  0x2b   :  { %p470_p5 = scmp.ne.s32.totalorder %s43_s10, %s469_s27  ;;  %p475_p7 = scmp.lt.s32.totalorder %s469_s27, %s469_s27 }
  0x2d   :  { %p476_p8 = por %p475_p7, %p474_p6 }
  0x2f   :  { %p477_p9 = pnand %p476_p8, %p470_p5 }
  0x31   :  { %480 = shalt.err (!%p477_p9)
}
  0x32   :  { %48 = dma.hbm_to_vmem [thread:$0]  %s610_s3, 1024, %s43_s10, [#allocation6], %s510_s28, %s510_s28, %s511_s29  }
  0x33   :  { %503 = dma.done.wait [#allocation3], 128  }
  0x34   :  { %504 = vsyncadd [#allocation3], 4294967168 }
  0x35   :  { %505 = dma.done.wait [#allocation6], 2048  }
  0x36   :  { %506 = vsyncadd [#allocation6], 4294965248  ;;  %v514_v0 = vmov 0.0   ;;  %vm515_vm0 = vmmov 0   ;;  %v395_v1 = vld [vmem:[#allocation5] sm:$0xff]   ;;  %v396_v2 = vld [vmem:[#allocation5 + $0x8] sm:$0xff]  }
  0x37   :  { %347 = vmatprep.subr.bf16.mxu0 %v514_v0  ;;  %363 = vmatprep.mubr.msk.bf16.mxu0 %vm515_vm0, %v514_v0  ;;  %v397_v3 = vld [vmem:[#allocation5 + $0x10] sm:$0xff]   ;;  %v403_v4 = vld [vmem:[#allocation7] sm:$0xff]   ;;  %v398_v5 = vld [vmem:[#allocation5 + $0x18] sm:$0xff]  }
  0x38   :  { %367 = vmatprep.subr.bf16.mxu1 %v514_v0  ;;  %383 = vmatprep.mubr.msk.bf16.mxu1 %vm515_vm0, %v514_v0  ;;  %v404_v6 = vld [vmem:[#allocation7 + $0x8] sm:$0xff]   ;;  %v399_v7 = vld [vmem:[#allocation5 + $0x20] sm:$0xff]   ;;  %v405_v8 = vld [vmem:[#allocation7 + $0x10] sm:$0xff]  }
  0x39   :  { %348 = vmatpush3.bf16.msra.mxu0 %v395_v1  ;;  %368 = vmatpush3.bf16.msra.mxu1 %v403_v4  ;;  %v400_v9 = vld [vmem:[#allocation5 + $0x28] sm:$0xff]   ;;  %v401_v10 = vld [vmem:[#allocation5 + $0x30] sm:$0xff]   ;;  %v402_v11 = vld [vmem:[#allocation5 + $0x38] sm:$0xff]  }
  0x3a   :  { %349 = vmatprep.subr.bf16.mxu0 %v514_v0  ;;  %369 = vmatprep.subr.bf16.mxu1 %v514_v0  ;;  %v61_v12 = vld [vmem:[#allocation2] sm:$0xff]  ;;  %v407_v15 = vld [vmem:[#allocation7 + $0x20] sm:$0xff]   ;;  %v408_v16 = vld [vmem:[#allocation7 + $0x28] sm:$0xff]  }
  0x3b   :  { %v79_v13 = vpack.c.bf16 %v61_v12, %v61_v12  ;;  %v406_v14 = vld [vmem:[#allocation7 + $0x18] sm:$0xff]   ;;  %v409_v17 = vld [vmem:[#allocation7 + $0x30] sm:$0xff]  }
  0x3c   :  { %v410_v18 = vld [vmem:[#allocation7 + $0x38] sm:$0xff]  }
  0x3d   :  { %350 = vmatpush3.bf16.msra.mxu0 %v396_v2  ;;  %370 = vmatpush3.bf16.msra.mxu1 %v404_v6  ;;  %v311_v19 = vld [vmem:[%s609_s2] ss:$0 sm:$0xff]  ;;  %s516_s2 = smov [#allocation8]  }
  0x3e   :  { %351 = vmatprep.subr.bf16.mxu0 %v514_v0  ;;  %371 = vmatprep.subr.bf16.mxu1 %v514_v0  ;;  %v320_v30 = vld [vmem:[%s611_s4] ss:$0 sm:$0xff]  ;;  %s301_s7 = sshll.u32 %s516_s2, 4  ;;  %s302_s7 = int_to_ptr.vmem [resolvable:$true] %s301_s7 }
  0x3f   :  { %s481_s8 = scalar_lea.vmem %s302_s7, 128  ;;  %p486_p11 = scmp.lt.s32.totalorder %s302_s7, %s302_s7 }
  0x40   :  { %p482_p10 = scmp.ne.s32.totalorder %s302_s7, %s481_s8  ;;  %p487_p12 = scmp.lt.s32.totalorder %s481_s8, %s481_s8 }
  0x41   :  { %352 = vmatpush3.bf16.msra.mxu0 %v397_v3  ;;  %372 = vmatpush3.bf16.msra.mxu1 %v405_v8 }
  0x42   :  { %353 = vmatprep.subr.bf16.mxu0 %v514_v0  ;;  %373 = vmatprep.subr.bf16.mxu1 %v514_v0  ;;  %p488_p13 = por %p487_p12, %p486_p11 }
  0x44   :  { %p489_p0 = pnand %p488_p13, %p482_p10 }
  0x45   :  { %354 = vmatpush3.bf16.msra.mxu0 %v398_v5  ;;  %374 = vmatpush3.bf16.msra.mxu1 %v406_v14 }
  0x46   :  { %355 = vmatprep.subr.bf16.mxu0 %v514_v0  ;;  %375 = vmatprep.subr.bf16.mxu1 %v514_v0 }
  0x49   :  { %356 = vmatpush3.bf16.msra.mxu0 %v399_v7  ;;  %376 = vmatpush3.bf16.msra.mxu1 %v407_v15 }
  0x4a   :  { %357 = vmatprep.subr.bf16.mxu0 %v514_v0  ;;  %377 = vmatprep.subr.bf16.mxu1 %v514_v0 }
  0x4d   :  { %358 = vmatpush3.bf16.msra.mxu0 %v400_v9  ;;  %378 = vmatpush3.bf16.msra.mxu1 %v408_v16 }
  0x4e   :  { %359 = vmatprep.subr.bf16.mxu0 %v514_v0  ;;  %379 = vmatprep.subr.bf16.mxu1 %v514_v0 }
  0x51   :  { %360 = vmatpush3.bf16.msra.mxu0 %v401_v10  ;;  %380 = vmatpush3.bf16.msra.mxu1 %v409_v17 }
  0x52   :  { %361 = vmatprep.subr.bf16.mxu0 %v514_v0  ;;  %381 = vmatprep.subr.bf16.mxu1 %v514_v0 }
  0x55   :  { %362 = vmatpush3.bf16.msra.mxu0 %v402_v11  ;;  %382 = vmatpush3.bf16.msra.mxu1 %v410_v18 }
  0x58   :  { %364 = vmatmul.mubr.bf16.vlgmr.msra.gmra.mrb[0].mxu0 %v79_v13 }
 0x12b   :  { %v168_v20 = vpop.f32.mrb[0].mxu0 }
 0x12c   :  { %v169_v21 = vadd.f32 %v311_v19, %v168_v20  ;;  %v365_v22 = vpop.f32.mrb[1].mxu0 }
 0x12d   :  { %v171_v23 = vpop.f32.mrb[2].mxu0 }
 0x12e   :  { %v174_v24 = vmul.f32 0.5, %v169_v21  ;;  %v366_v25 = vpop.f32.mrb[3].mxu0 }
 0x130   :  { %411 = vtanh.f32 %v174_v24 }
 0x13a   :  { %v412_v26 = vpop.eup %411 }
 0x13b   :  { %v176_v27 = vmul.f32 0.5, %v412_v26 }
 0x13d   :  { %v177_v28 = vadd.f32 0.5, %v176_v27 }
 0x13f   :  { %v195_v29 = vpack.c.bf16 %v177_v28, %v177_v28 }
 0x141   :  { %384 = vmatmul.mubr.bf16.vlgmr.msra.gmra.mrb[0].mxu1 %v195_v29 }
 0x214   :  { %v284_v31 = vpop.f32.mrb[0].mxu1 }
 0x215   :  { %v285_v32 = vadd.f32 %v320_v30, %v284_v31  ;;  %v385_v33 = vpop.f32.mrb[1].mxu1 }
 0x216   :  { %v287_v34 = vpop.f32.mrb[2].mxu1 }
 0x217   :  { %v290_v35 = vmul.f32 0.5, %v285_v32  ;;  %v386_v36 = vpop.f32.mrb[3].mxu1 }
 0x219   :  { %413 = vtanh.f32 %v290_v35 }
 0x223   :  { %v414_v37 = vpop.eup %413 }
 0x224   :  { %v292_v38 = vmul.f32 0.5, %v414_v37 }
 0x226   :  { %v293_v39 = vadd.f32 0.5, %v292_v38 }
 0x228   :  { %294 = vst [vmem:[#allocation8] sm:$0xff] %v293_v39 }
 0x229   :  { %492 = shalt.err (!%p489_p0)
}
 0x22a   :  { %s493_s10 = scalar_lea.hbm %s612_s5, 128 }
 0x22b   :  { %p494_p1 = scmp.ne.s32.totalorder %s612_s5, %s493_s10  ;;  %p497_p2 = scmp.lt.u32.totalorder %s493_s10, %s612_s5 }
 0x22d   :  { %p499_p3 = pnand %p497_p2, %p494_p1 }
 0x22f   :  { %502 = shalt.err (!%p499_p3)
}
 0x230   :  { %304 = dma.vmem_to_hbm [thread:$0]  %s302_s7, 128, %s612_s5, [#allocation4]  }
 0x231   :  { %507 = dma.done.wait [#allocation4], 128  }
 0x232   :  { %508 = vsyncadd [#allocation4], 4294967168 }
 0x233   :  { %308 = vsyncpa [#allocation3], 1 }
 0x234   :  { %309 = vsyncpa [#allocation6], 1 }
 0x235   :  { %310 = vsyncpa [#allocation4], 1 }

</bundles_post_ra>
